<compile_context>
chip_gen: v7x
topology: tpu7x:2x2x1
jax: 0.10.0
libtpu: 0.0.40
codegen_flags: <defaults>
</compile_context>

<pallas_src>
import functools
import math

import numpy as np
import jax
import jax.numpy as jnp
from jax.experimental import pallas as pl
from jax.experimental.pallas import tpu as pltpu

VERY_SMALL_NUMBER = 1e-12

_VMEM_LIMIT_BYTES = 48 * 1024 * 1024   # valid on v5e/v6e (128 MiB) and v7x (64 MiB)
_VMEM_TILE_BUDGET = 30 * 1024 * 1024   # working-set budget used when sizing tiles


def _round_up(x, m):
    return (x + m - 1) // m * m


def _cdiv(a, b):
    return -(-a // b)


def _vreg_bytes(rows, cols, dtype):
    """Approx VMEM footprint of a [rows, cols] buffer after (sublane,128) tiling."""
    it = np.dtype(dtype).itemsize
    sub = 8 * max(1, 4 // it)
    return _round_up(max(rows, 1), sub) * _round_up(max(cols, 1), 128) * it


def _node_tiling(n, tile, align=8):
    """Pick (tile_n, num_tiles) with < align rows of padding waste per tile."""
    n_al = _round_up(n, align)
    if n_al <= tile:
        return n_al, 1
    num = _cdiv(n, tile)
    tn = _round_up(_cdiv(n, num), align)
    return tn, num


def _pad_rows(arr, n_p):
    n = arr.shape[0]
    if n_p == n:
        return arr
    pad = [(0, n_p - n)] + [(0, 0)] * (arr.ndim - 1)
    return jnp.pad(arr, pad)


# --------------------------------------------------------------------------- #
# anchor_mp=True: fused single-call kernel, grid = (2 passes, node tiles)
# --------------------------------------------------------------------------- #
def _anchor_fused_kernel(x_ref, adj_ref, w_ref, b_ref, out_ref,
                         msg_acc, col_acc, msg_c, *, compute_dtype):
    p = pl.program_id(0)     # 0: accumulate msg/col, 1: emit output
    i = pl.program_id(1)     # node tile
    last = pl.num_programs(1) - 1

    @pl.when(jnp.logical_and(p == 0, i == 0))
    def _():
        msg_acc[...] = jnp.zeros_like(msg_acc)
        col_acc[...] = jnp.zeros_like(col_acc)

    @pl.when(p == 0)
    def _():
        adj = adj_ref[...]                                           # [tn, A]
        ones = jnp.ones((adj.shape[0], 1), dtype=adj.dtype)
        support = jnp.dot(x_ref[...], w_ref[...],
                          preferred_element_type=jnp.float32)        # [tn, F_out]
        # col_sum += adj^T @ 1  -> [A, 1]   (no transpose materialized)
        col_acc[...] += jax.lax.dot_general(
            adj, ones, dimension_numbers=(((0,), (0,)), ((), ())),
            preferred_element_type=jnp.float32)
        # msg += adj^T @ support -> [A, F_out]
        msg_acc[...] += jax.lax.dot_general(
            adj, support.astype(compute_dtype),
            dimension_numbers=(((0,), (0,)), ((), ())),
            preferred_element_type=jnp.float32)

        @pl.when(i == last)
        def _():
            # Fold the column normalization into the epilogue; cast once.
            inv_col = pl.reciprocal(
                jnp.maximum(col_acc[...], VERY_SMALL_NUMBER), approx=True)
            msg_c[...] = (msg_acc[...] * inv_col).astype(msg_c.dtype)

    @pl.when(p == 1)
    def _():
        adj = adj_ref[...]                                           # [tn, A]
        ones = jnp.ones((adj.shape[1], 1), dtype=adj.dtype)
        row_sum = jnp.dot(adj, ones,
                          preferred_element_type=jnp.float32)        # [tn, 1]
        inv_row = pl.reciprocal(
            jnp.maximum(row_sum, VERY_SMALL_NUMBER), approx=True)
        agg = jnp.dot(adj, msg_c[...],
                      preferred_element_type=jnp.float32)            # [tn, F_out]
        out_ref[...] = (agg * inv_row + b_ref[...]).astype(out_ref.dtype)


# --------------------------------------------------------------------------- #
# anchor_mp=True: split two-call variant (emit phase is a "parallel" grid)
# --------------------------------------------------------------------------- #
def _anchor_phase1_kernel(x_ref, adj_ref, w_ref, msg_ref, msg_acc, col_acc,
                          *, compute_dtype):
    i = pl.program_id(0)

    @pl.when(i == 0)
    def _():
        msg_acc[...] = jnp.zeros_like(msg_acc)
        col_acc[...] = jnp.zeros_like(col_acc)

    adj = adj_ref[...]
    ones = jnp.ones((adj.shape[0], 1), dtype=adj.dtype)
    support = jnp.dot(x_ref[...], w_ref[...],
                      preferred_element_type=jnp.float32)
    col_acc[...] += jax.lax.dot_general(
        adj, ones, dimension_numbers=(((0,), (0,)), ((), ())),
        preferred_element_type=jnp.float32)
    msg_acc[...] += jax.lax.dot_general(
        adj, support.astype(compute_dtype),
        dimension_numbers=(((0,), (0,)), ((), ())),
        preferred_element_type=jnp.float32)

    @pl.when(i == pl.num_programs(0) - 1)
    def _():
        inv_col = pl.reciprocal(
            jnp.maximum(col_acc[...], VERY_SMALL_NUMBER), approx=True)
        msg_ref[...] = (msg_acc[...] * inv_col).astype(msg_ref.dtype)


def _anchor_phase2_kernel(adj_ref, msg_ref, b_ref, out_ref):
    adj = adj_ref[...]
    ones = jnp.ones((adj.shape[1], 1), dtype=adj.dtype)
    row_sum = jnp.dot(adj, ones, preferred_element_type=jnp.float32)
    inv_row = pl.reciprocal(
        jnp.maximum(row_sum, VERY_SMALL_NUMBER), approx=True)
    agg = jnp.dot(adj, msg_ref[...], preferred_element_type=jnp.float32)
    out_ref[...] = (agg * inv_row + b_ref[...]).astype(out_ref.dtype)


# --------------------------------------------------------------------------- #
# anchor_mp=False: plain node-node adjacency  out = adj @ (x @ W) + b
# --------------------------------------------------------------------------- #
def _support_kernel(x_ref, w_ref, out_ref):
    out_ref[...] = jnp.dot(x_ref[...], w_ref[...],
                           preferred_element_type=jnp.float32).astype(out_ref.dtype)


def _node_aggregate_kernel(adj_ref, s_ref, b_ref, out_ref):
    k = pl.program_id(1)

    @pl.when(k == 0)
    def _():
        out_ref[...] = jnp.zeros_like(out_ref)

    # out block index is constant over k -> VMEM-resident accumulator (no scratch).
    out_ref[...] += jnp.dot(adj_ref[...], s_ref[...],
                            preferred_element_type=jnp.float32)

    @pl.when(k == pl.num_programs(1) - 1)
    def _():
        out_ref[...] += b_ref[...]


# --------------------------------------------------------------------------- #
# wrapper
# --------------------------------------------------------------------------- #
def anchor_gnn_layer(x, weight, adj, bias=None, *, anchor_mp=True,
                     tile_n=1024, matmul_dtype=jnp.bfloat16, fuse_phases=True):
    """Pallas implementation of AnchorGNNLayer.forward (no batch norm).

    fuse_phases=True  -> single pallas_call (best on 1-TensorCore v5e/v6e).
    fuse_phases=False -> split accumulate/emit calls; emit phase uses a
                         "parallel" grid (megacore on multi-core chips).
    """
    n, f_in = x.shape
    f_out = weight.shape[1]
    cdt = np.dtype(matmul_dtype)
    it = cdt.itemsize

    # Host-side casts only; skip copies when already in the right dtype.
    w_c = weight if weight.dtype == cdt else weight.astype(cdt)
    x_c = x if x.dtype == cdt else x.astype(cdt)
    adj_c = adj if adj.dtype == cdt else adj.astype(cdt)
    if bias is None:
        b2 = jnp.zeros((1, f_out), jnp.float32)
    else:
        b2 = jnp.reshape(bias, (1, f_out)).astype(jnp.float32)

    if anchor_mp:
        a = adj.shape[1]

        def vmem_estimate(tn):
            return (2 * _vreg_bytes(tn, f_in, cdt)              # x (double-buffered)
                    + 2 * _vreg_bytes(tn, a, cdt)               # adj
                    + 2 * _vreg_bytes(tn, f_out, jnp.float32)   # out
                    + 2 * _vreg_bytes(f_in, f_out, cdt)         # weight
                    + 2 * _vreg_bytes(1, f_out, jnp.float32)    # bias
                    + _vreg_bytes(a, f_out, jnp.float32)        # msg accumulator
                    + _vreg_bytes(a, 1, jnp.float32)            # col accumulator
                    + _vreg_bytes(a, f_out, cdt))               # normalized msg

        tile = max(64, int(tile_n))
        while True:
            tn, num_tiles = _node_tiling(n, tile)
            if vmem_estimate(tn) <= _VMEM_TILE_BUDGET or tile <= 64:
                break
            tile //= 2
        n_p = tn * num_tiles

        x_p = _pad_rows(x_c, n_p)
        adj_p = _pad_rows(adj_c, n_p)

        cost = pl.CostEstimate(
            flops=2 * n_p * f_in * f_out + 4 * n_p * a * f_out,
            transcendentals=n_p + a,
            bytes_accessed=(2 * n_p * a * it + n_p * f_in * it + f_in * f_out * it
                            + n_p * f_out * 4 + a * f_out * (4 + it)))

        if fuse_phases:
            out_p = pl.pallas_call(
                functools.partial(_anchor_fused_kernel, compute_dtype=cdt),
                out_shape=jax.ShapeDtypeStruct((n_p, f_out), jnp.float32),
                grid_spec=pltpu.PrefetchScalarGridSpec(
                    num_scalar_prefetch=0,
                    grid=(2, num_tiles),
                    in_specs=[
                        pl.BlockSpec((tn, f_in), lambda p, i: (i * (1 - p), 0)),
                        pl.BlockSpec((tn, a), lambda p, i: (i, 0)),
                        pl.BlockSpec((f_in, f_out), lambda p, i: (0, 0)),
                        pl.BlockSpec((1, f_out), lambda p, i: (0, 0)),
                    ],
                    out_specs=pl.BlockSpec((tn, f_out), lambda p, i: (p * i, 0)),
                    scratch_shapes=[pltpu.VMEM((a, f_out), jnp.float32),
                                    pltpu.VMEM((a, 1), jnp.float32),
                                    pltpu.VMEM((a, f_out), cdt)]),
                compiler_params=pltpu.CompilerParams(
                    dimension_semantics=("arbitrary", "arbitrary"),
                    vmem_limit_bytes=_VMEM_LIMIT_BYTES),
                cost_estimate=cost,
            )(x_p, adj_p, w_c, b2)
        else:
            # Phase 1: sequential reduction over node tiles -> normalized msg [A, F_out]
            msg_c = pl.pallas_call(
                functools.partial(_anchor_phase1_kernel, compute_dtype=cdt),
                out_shape=jax.ShapeDtypeStruct((a, f_out), cdt),
                grid_spec=pltpu.PrefetchScalarGridSpec(
                    num_scalar_prefetch=0,
                    grid=(num_tiles,),
                    in_specs=[pl.BlockSpec((tn, f_in), lambda i: (i, 0)),
                              pl.BlockSpec((tn, a), lambda i: (i, 0)),
                              pl.BlockSpec((f_in, f_out), lambda i: (0, 0))],
                    out_specs=pl.BlockSpec((a, f_out), lambda i: (0, 0)),
                    scratch_shapes=[pltpu.VMEM((a, f_out), jnp.float32),
                                    pltpu.VMEM((a, 1), jnp.float32)]),
                compiler_params=pltpu.CompilerParams(
                    dimension_semantics=("arbitrary",),
                    vmem_limit_bytes=_VMEM_LIMIT_BYTES),
                cost_estimate=cost,
            )(x_p, adj_p, w_c)

            # Phase 2: embarrassingly parallel over node tiles -> output
            out_p = pl.pallas_call(
                _anchor_phase2_kernel,
                out_shape=jax.ShapeDtypeStruct((n_p, f_out), jnp.float32),
                grid_spec=pltpu.PrefetchScalarGridSpec(
                    num_scalar_prefetch=0,
                    grid=(num_tiles,),
                    in_specs=[pl.BlockSpec((tn, a), lambda i: (i, 0)),
                              pl.BlockSpec((a, f_out), lambda i: (0, 0)),
                              pl.BlockSpec((1, f_out), lambda i: (0, 0))],
                    out_specs=pl.BlockSpec((tn, f_out), lambda i: (i, 0))),
                compiler_params=pltpu.CompilerParams(
                    dimension_semantics=("parallel",),
                    vmem_limit_bytes=_VMEM_LIMIT_BYTES),
            )(adj_p, msg_c, b2)
    else:
        # adj is a node-node adjacency [n, n]
        n8 = _round_up(n, 8)
        tile = max(128, int(tile_n))
        if n8 <= tile:
            tn, num_tiles = n8, 1
        else:
            tn = max(128, (min(tile, n8) // 128) * 128)
            num_tiles = _cdiv(n, tn)
        n_p = tn * num_tiles

        x_p = _pad_rows(x_c, n_p)
        adj_p = adj_c if n_p == n else jnp.pad(adj_c, ((0, n_p - n), (0, n_p - n)))

        support = pl.pallas_call(
            _support_kernel,
            out_shape=jax.ShapeDtypeStruct((n_p, f_out), cdt),
            grid_spec=pltpu.PrefetchScalarGridSpec(
                num_scalar_prefetch=0,
                grid=(num_tiles,),
                in_specs=[pl.BlockSpec((tn, f_in), lambda i: (i, 0)),
                          pl.BlockSpec((f_in, f_out), lambda i: (0, 0))],
                out_specs=pl.BlockSpec((tn, f_out), lambda i: (i, 0))),
            compiler_params=pltpu.CompilerParams(
                dimension_semantics=("parallel",),
                vmem_limit_bytes=_VMEM_LIMIT_BYTES),
        )(x_p, w_c)

        out_p = pl.pallas_call(
            _node_aggregate_kernel,
            out_shape=jax.ShapeDtypeStruct((n_p, f_out), jnp.float32),
            grid_spec=pltpu.PrefetchScalarGridSpec(
                num_scalar_prefetch=0,
                grid=(num_tiles, num_tiles),
                in_specs=[pl.BlockSpec((tn, tn), lambda i, k: (i, k)),
                          pl.BlockSpec((tn, f_out), lambda i, k: (k, 0)),
                          pl.BlockSpec((1, f_out), lambda i, k: (0, 0))],
                out_specs=pl.BlockSpec((tn, f_out), lambda i, k: (i, 0))),
            compiler_params=pltpu.CompilerParams(
                dimension_semantics=("parallel", "arbitrary"),
                vmem_limit_bytes=_VMEM_LIMIT_BYTES),
        )(adj_p, support, b2)

    return out_p[:n, :f_out]


# --------------------------------------------------------------------------- #
# pure-JAX reference
# --------------------------------------------------------------------------- #
def _reference(x, weight, adj, bias, anchor_mp=True):
    support = x @ weight
    if anchor_mp:
        node_norm = adj / jnp.maximum(jnp.sum(adj, axis=-2, keepdims=True),
                                      VERY_SMALL_NUMBER)
        anchor_norm = adj / jnp.maximum(jnp.sum(adj, axis=-1, keepdims=True),
                                        VERY_SMALL_NUMBER)
        out = anchor_norm @ (node_norm.T @ support)
    else:
        out = adj @ support
    return out + bias


if __name__ == "__main__":
    # Shapes: N nodes, A anchors, in_features -> out_features
    N, A = 48, 8
    in_features, out_features = 32, 32

    key = jax.random.PRNGKey(0)
    k_x, k_adj, k_w, k_adj2 = jax.random.split(key, 4)

    # Parameter init mirroring the module: xavier_uniform weight, zero bias.
    bound = math.sqrt(6.0 / (in_features + out_features))
    weight = jax.random.uniform(k_w, (in_features, out_features),
                                dtype=jnp.float32, minval=-bound, maxval=bound)
    bias = jnp.zeros((out_features,), dtype=jnp.float32)

    x = jax.random.normal(k_x, (N, in_features), dtype=jnp.float32)
    adj = jax.nn.softplus(jax.random.normal(k_adj, (N, A), dtype=jnp.float32))

    ref = _reference(x, weight, adj, bias, anchor_mp=True)

    # 1) fused single-call kernel, f32 operands, 3 node tiles (multi-tile reduction)
    out_f32 = anchor_gnn_layer(x, weight, adj, bias, anchor_mp=True,
                               tile_n=16, matmul_dtype=jnp.float32)
    out_f32 = jax.block_until_ready(out_f32)
    assert out_f32.shape == (N, out_features)
    assert jnp.allclose(out_f32, ref, atol=2e-2, rtol=2e-2), "fused f32 anchor path mismatch"

    # 2) fused single-call kernel, bf16 MXU operands (default fast path, single tile)
    out_bf16 = anchor_gnn_layer(x, weight, adj, bias, anchor_mp=True)
    out_bf16 = jax.block_until_ready(out_bf16)
    assert jnp.allclose(out_bf16, ref, atol=5e-2, rtol=5e-2), "fused bf16 anchor path mismatch"

    # 3) split two-call variant (parallel emit phase, e.g. v7x), bf16, 3 node tiles
    out_split = anchor_gnn_layer(x, weight, adj, bias, anchor_mp=True,
                                 tile_n=16, fuse_phases=False)
    out_split = jax.block_until_ready(out_split)
    assert jnp.allclose(out_split, ref, atol=5e-2, rtol=5e-2), "split anchor path mismatch"

    # 4) plain node-node message passing (anchor_mp=False)
    adj_nn = jax.nn.softplus(jax.random.normal(k_adj2, (N, N), dtype=jnp.float32))
    out_nn = anchor_gnn_layer(x, weight, adj_nn, bias, anchor_mp=False)
    out_nn = jax.block_until_ready(out_nn)
    ref_nn = _reference(x, weight, adj_nn, bias, anchor_mp=False)
    assert jnp.allclose(out_nn, ref_nn, atol=1e-1, rtol=5e-2), "node path mismatch"

    print("KERNEL_OK")
</pallas_src>

<mosaic_0001>
module attributes {stable_mosaic.version = 11 : i64} {
  func.func @_anchor_fused_kernel(%arg0: i32, %arg1: i32, %arg2: memref<48x32xf32, #tpu.memory_space<vmem>>, %arg3: memref<48x8xf32, #tpu.memory_space<vmem>>, %arg4: memref<32x32xf32, #tpu.memory_space<vmem>>, %arg5: memref<1x32xf32, #tpu.memory_space<vmem>>, %arg6: memref<48x32xf32, #tpu.memory_space<vmem>>, %arg7: memref<8x32xf32, #tpu.memory_space<vmem>>, %arg8: memref<8x1xf32, #tpu.memory_space<vmem>>, %arg9: memref<8x32xf32, #tpu.memory_space<vmem>>) attributes {dimension_semantics = [#tpu.dimension_semantics<arbitrary>, #tpu.dimension_semantics<arbitrary>], iteration_bounds = array<i64: 2, 1>, scalar_prefetch = 0 : i64, scratch_operands = 3 : i64, tpu.core_type = #tpu.core_type<tc>, window_params = [{transform_indices = @transform_0, window_bounds = array<i64: 48, 32>}, {transform_indices = @transform_1, window_bounds = array<i64: 48, 8>}, {pipeline_mode = #tpu.pipeline_mode<synchronous>, transform_indices = @transform_2, window_bounds = array<i64: 32, 32>}, {pipeline_mode = #tpu.pipeline_mode<synchronous>, transform_indices = @transform_3, window_bounds = array<i64: 1, 32>}, {transform_indices = @transform_4, window_bounds = array<i64: 48, 32>}]} {
    %c0_i32 = arith.constant 0 : i32
    %0 = arith.cmpi eq, %arg0, %c0_i32 : i32
    %c0_i32_0 = arith.constant 0 : i32
    %1 = arith.cmpi eq, %arg1, %c0_i32_0 : i32
    %2 = arith.andi %0, %1 : i1
    %3 = arith.extui %2 : i1 to i32
    %c0_i32_1 = arith.constant 0 : i32
    %4 = arith.cmpi ne, %3, %c0_i32_1 : i32
    scf.if %4 {
      %cst = arith.constant 0.000000e+00 : f32
      %11 = vector.broadcast %cst : f32 to vector<8x32xf32>
      %c0 = arith.constant 0 : index
      %c0_5 = arith.constant 0 : index
      %12 = vector.load %arg7[%c0, %c0_5] : memref<8x32xf32, #tpu.memory_space<vmem>>, vector<8x32xf32>
      tpu.vector_store %arg7[%c0, %c0_5], %11 {strides = array<i32>} : memref<8x32xf32, #tpu.memory_space<vmem>>, vector<8x32xf32>,
      %cst_6 = arith.constant 0.000000e+00 : f32
      %13 = vector.broadcast %cst_6 : f32 to vector<8x1xf32>
      %c0_7 = arith.constant 0 : index
      %c0_8 = arith.constant 0 : index
      %14 = vector.load %arg8[%c0_7, %c0_8] : memref<8x1xf32, #tpu.memory_space<vmem>>, vector<8x1xf32>
      tpu.vector_store %arg8[%c0_7, %c0_8], %13 {strides = array<i32>} : memref<8x1xf32, #tpu.memory_space<vmem>>, vector<8x1xf32>,
    } else {
    }
    %c0_i32_2 = arith.constant 0 : i32
    %5 = arith.cmpi eq, %arg0, %c0_i32_2 : i32
    %6 = arith.extui %5 : i1 to i32
    %c0_i32_3 = arith.constant 0 : i32
    %7 = arith.cmpi ne, %6, %c0_i32_3 : i32
    scf.if %7 {
      %c0 = arith.constant 0 : index
      %c0_5 = arith.constant 0 : index
      %11 = vector.load %arg3[%c0, %c0_5] : memref<48x8xf32, #tpu.memory_space<vmem>>, vector<48x8xf32>
      %cst = arith.constant 1.000000e+00 : f32
      %12 = vector.broadcast %cst : f32 to vector<48x1xf32>
      %c0_6 = arith.constant 0 : index
      %c0_7 = arith.constant 0 : index
      %13 = vector.load %arg2[%c0_6, %c0_7] : memref<48x32xf32, #tpu.memory_space<vmem>>, vector<48x32xf32>
      %c0_8 = arith.constant 0 : index
      %c0_9 = arith.constant 0 : index
      %14 = vector.load %arg4[%c0_8, %c0_9] : memref<32x32xf32, #tpu.memory_space<vmem>>, vector<32x32xf32>
      %cst_10 = arith.constant dense<0.000000e+00> : vector<48x32xf32>
      %15 = tpu.matmul %13, %14, %cst_10 {dimension_numbers = #tpu.dot_dimension_numbers<[1], [0], [0], [1], [0, 0, 1, 1], [], []>} : vector<48x32xf32>, vector<32x32xf32>, vector<48x32xf32> -> vector<48x32xf32>
      %c0_11 = arith.constant 0 : index
      %c0_12 = arith.constant 0 : index
      %16 = vector.load %arg8[%c0_11, %c0_12] : memref<8x1xf32, #tpu.memory_space<vmem>>, vector<8x1xf32>
      %cst_13 = arith.constant dense<0.000000e+00> : vector<8x1xf32>
      %17 = tpu.matmul %11, %12, %cst_13 {dimension_numbers = #tpu.dot_dimension_numbers<[0], [0], [1], [1], [0, 1, 1, 1], [], []>} : vector<48x8xf32>, vector<48x1xf32>, vector<8x1xf32> -> vector<8x1xf32>
      %18 = arith.addf %16, %17 : vector<8x1xf32>
      %c0_14 = arith.constant 0 : index
      %c0_15 = arith.constant 0 : index
      %19 = vector.load %arg8[%c0_14, %c0_15] : memref<8x1xf32, #tpu.memory_space<vmem>>, vector<8x1xf32>
      tpu.vector_store %arg8[%c0_14, %c0_15], %18 {strides = array<i32>} : memref<8x1xf32, #tpu.memory_space<vmem>>, vector<8x1xf32>,
      %c0_16 = arith.constant 0 : index
      %c0_17 = arith.constant 0 : index
      %20 = vector.load %arg7[%c0_16, %c0_17] : memref<8x32xf32, #tpu.memory_space<vmem>>, vector<8x32xf32>
      %cst_18 = arith.constant dense<0.000000e+00> : vector<8x32xf32>
      %21 = tpu.matmul %11, %15, %cst_18 {dimension_numbers = #tpu.dot_dimension_numbers<[0], [0], [1], [1], [0, 1, 1, 1], [], []>} : vector<48x8xf32>, vector<48x32xf32>, vector<8x32xf32> -> vector<8x32xf32>
      %22 = arith.addf %20, %21 : vector<8x32xf32>
      %c0_19 = arith.constant 0 : index
      %c0_20 = arith.constant 0 : index
      %23 = vector.load %arg7[%c0_19, %c0_20] : memref<8x32xf32, #tpu.memory_space<vmem>>, vector<8x32xf32>
      tpu.vector_store %arg7[%c0_19, %c0_20], %22 {strides = array<i32>} : memref<8x32xf32, #tpu.memory_space<vmem>>, vector<8x32xf32>,
      %c0_i32_21 = arith.constant 0 : i32
      %24 = arith.cmpi eq, %arg1, %c0_i32_21 : i32
      %25 = arith.extui %24 : i1 to i32
      %c0_i32_22 = arith.constant 0 : i32
      %26 = arith.cmpi ne, %25, %c0_i32_22 : i32
      scf.if %26 {
        %c0_23 = arith.constant 0 : index
        %c0_24 = arith.constant 0 : index
        %27 = vector.load %arg8[%c0_23, %c0_24] : memref<8x1xf32, #tpu.memory_space<vmem>>, vector<8x1xf32>
        %cst_25 = arith.constant 9.99999996E-13 : f32
        %28 = vector.broadcast %cst_25 : f32 to vector<8x1xf32>
        %29 = arith.maximumf %27, %28 : vector<8x1xf32>
        %30 = tpu.reciprocal %29 {approx = true} : vector<8x1xf32> -> vector<8x1xf32>
        %c0_26 = arith.constant 0 : index
        %c0_27 = arith.constant 0 : index
        %31 = vector.load %arg7[%c0_26, %c0_27] : memref<8x32xf32, #tpu.memory_space<vmem>>, vector<8x32xf32>
        %32 = vector.broadcast %30 : vector<8x1xf32> to vector<8x32xf32>
        %33 = arith.mulf %31, %32 : vector<8x32xf32>
        %c0_28 = arith.constant 0 : index
        %c0_29 = arith.constant 0 : index
        %34 = vector.load %arg9[%c0_28, %c0_29] : memref<8x32xf32, #tpu.memory_space<vmem>>, vector<8x32xf32>
        tpu.vector_store %arg9[%c0_28, %c0_29], %33 {strides = array<i32>} : memref<8x32xf32, #tpu.memory_space<vmem>>, vector<8x32xf32>,
      } else {
      }
    } else {
    }
    %c1_i32 = arith.constant 1 : i32
    %8 = arith.cmpi eq, %arg0, %c1_i32 : i32
    %9 = arith.extui %8 : i1 to i32
    %c0_i32_4 = arith.constant 0 : i32
    %10 = arith.cmpi ne, %9, %c0_i32_4 : i32
    scf.if %10 {
      %c0 = arith.constant 0 : index
      %c0_5 = arith.constant 0 : index
      %11 = vector.load %arg3[%c0, %c0_5] : memref<48x8xf32, #tpu.memory_space<vmem>>, vector<48x8xf32>
      %cst = arith.constant 1.000000e+00 : f32
      %12 = vector.broadcast %cst : f32 to vector<8x1xf32>
      %cst_6 = arith.constant dense<0.000000e+00> : vector<48x1xf32>
      %13 = tpu.matmul %11, %12, %cst_6 {dimension_numbers = #tpu.dot_dimension_numbers<[1], [0], [0], [1], [0, 0, 1, 1], [], []>} : vector<48x8xf32>, vector<8x1xf32>, vector<48x1xf32> -> vector<48x1xf32>
      %cst_7 = arith.constant 9.99999996E-13 : f32
      %14 = vector.broadcast %cst_7 : f32 to vector<48x1xf32>
      %15 = arith.maximumf %13, %14 : vector<48x1xf32>
      %16 = tpu.reciprocal %15 {approx = true} : vector<48x1xf32> -> vector<48x1xf32>
      %c0_8 = arith.constant 0 : index
      %c0_9 = arith.constant 0 : index
      %17 = vector.load %arg9[%c0_8, %c0_9] : memref<8x32xf32, #tpu.memory_space<vmem>>, vector<8x32xf32>
      %cst_10 = arith.constant dense<0.000000e+00> : vector<48x32xf32>
      %18 = tpu.matmul %11, %17, %cst_10 {dimension_numbers = #tpu.dot_dimension_numbers<[1], [0], [0], [1], [0, 0, 1, 1], [], []>} : vector<48x8xf32>, vector<8x32xf32>, vector<48x32xf32> -> vector<48x32xf32>
      %19 = vector.broadcast %16 : vector<48x1xf32> to vector<48x32xf32>
      %20 = arith.mulf %18, %19 : vector<48x32xf32>
      %c0_11 = arith.constant 0 : index
      %c0_12 = arith.constant 0 : index
      %21 = vector.load %arg5[%c0_11, %c0_12] : memref<1x32xf32, #tpu.memory_space<vmem>>, vector<1x32xf32>
      %22 = vector.broadcast %21 : vector<1x32xf32> to vector<48x32xf32>
      %23 = arith.addf %20, %22 : vector<48x32xf32>
      %c0_13 = arith.constant 0 : index
      %c0_14 = arith.constant 0 : index
      %24 = vector.load %arg6[%c0_13, %c0_14] : memref<48x32xf32, #tpu.memory_space<vmem>>, vector<48x32xf32>
      tpu.vector_store %arg6[%c0_13, %c0_14], %23 {strides = array<i32>} : memref<48x32xf32, #tpu.memory_space<vmem>>, vector<48x32xf32>,
    } else {
    }
    return
  }
  func.func @transform_0(%arg0: i32, %arg1: i32) -> (i32, i32) {
    %c1_i32 = arith.constant 1 : i32
    %0 = arith.subi %c1_i32, %arg0 : i32
    %1 = arith.muli %arg1, %0 : i32
    %c0_i32 = arith.constant 0 : i32
    %c0_i32_0 = arith.constant 0 : i32
    return %1, %c0_i32 : i32, i32
  }
  func.func @transform_1(%arg0: i32, %arg1: i32) -> (i32, i32) {
    %c0_i32 = arith.constant 0 : i32
    %c0_i32_0 = arith.constant 0 : i32
    return %arg1, %c0_i32 : i32, i32
  }
  func.func @transform_2(%arg0: i32, %arg1: i32) -> (i32, i32) {
    %c0_i32 = arith.constant 0 : i32
    %c0_i32_0 = arith.constant 0 : i32
    %c0_i32_1 = arith.constant 0 : i32
    return %c0_i32, %c0_i32_0 : i32, i32
  }
  func.func @transform_3(%arg0: i32, %arg1: i32) -> (i32, i32) {
    %c0_i32 = arith.constant 0 : i32
    %c0_i32_0 = arith.constant 0 : i32
    %c0_i32_1 = arith.constant 0 : i32
    return %c0_i32, %c0_i32_0 : i32, i32
  }
  func.func @transform_4(%arg0: i32, %arg1: i32) -> (i32, i32) {
    %0 = arith.muli %arg0, %arg1 : i32
    %c0_i32 = arith.constant 0 : i32
    %c0_i32_0 = arith.constant 0 : i32
    return %0, %c0_i32 : i32, i32
  }
}

</mosaic_0001>

<bundles_post_ra>
// kernel: tpu_custom_call.1
= control target key start
LH: loop header
LB: loop body
LE: loop exit
PB: predicated region body
PF: predicated region fallthrough
CT: control target
= control target key end

     0   :  { %s1238_s15 = smov 0   ;;  %s1240_s16 = smov 0   ;;  %s1387_s0 = inlined_call_operand.vmem [shape: f32[48,32], index: 0, kind: input, shape index: {}]   ;;  %s1388_s1 = inlined_call_operand.vmem [shape: f32[48,8], index: 1, kind: input, shape index: {}]   ;;  %s1389_s2 = inlined_call_operand.vmem [shape: f32[32,32], index: 2, kind: input, shape index: {}]   ;;  %s1390_s3 = inlined_call_operand.vmem [shape: f32[1,32], index: 3, kind: input, shape index: {}]   ;;  %s1391_s4 = inlined_call_operand.vmem [shape: f32[48,32], index: 4, kind: output, shape index: {}]  }
   0x1   :  { %s1242_s17 = smov 0  }
   0x2 LB: > { %s26_s18 = sadd.s32 1, %s1199_s16  ;;  %p971_p0 = scmp.ge.s32.totalorder %s1203_s17, 1  ;;  %s1203_s17 = sphi %s1242_s17, %s14_s17   ;;  %s1199_s16 = sphi %s1240_s16, %s1393_s16   ;;  %s1195_s15 = sphi %s1238_s15, %s1392_s15  }
   0x3   : > { %p28_p1 = scmp.ge.s32.totalorder %s26_s18, 2  ;;  %p196_p2 = scmp.lt.s32.totalorder %s1203_s17, 3 }
   0x5   : > { %s1395_s18 = smov (%p28_p1, %s26_s18), 0  ;;  %p197_p3 = pnand %p971_p0, %p196_p2 }
   0x6   : > { %p254_p4 = scmp.eq.s32.totalorder (!%p197_p3), %s1195_s15, 0 }
   0x7   : > { %200 = sbr.rel (%p197_p3) target bundleno = 892 (0x37c), region = 36 }
   0xe   : > { %259 = sbr.rel (!%p254_p4) target bundleno = 21 (0x15), region = 40  ;;  %vm260_vm0 = vcmask (%p254_p4), 261120   ;;  %vm262_vm1 = vcmask (%p254_p4), 7168   ;;  %v1205_v0 = vmov (%p254_p4), 0.0  }
   0xf   : > { %261 = vst.msk [vmem:[#allocation2] sm:$0xff] (%p254_p4), %vm260_vm0, %v1205_v0 }
  0x10   : > { %263 = vst.msk [vmem:[#allocation3] sm:$0xff] (%p254_p4), %vm262_vm1, %v1205_v0 }
  0x15 PF: > { %p973_p5 = scmp.ne.s32.totalorder %s1195_s15, 0 }
  0x16   : > { %v267_v1 = vld [vmem:[%s1388_s1] sm:$0xff] (!%p973_p5)  ;;  %v280_v3 = vld [vmem:[%s1389_s2 + $0x8] sm:$0xff] (!%p973_p5)  ;;  %vm283_vm2 = vcmask (!%p973_p5), 261120   ;;  %v281_v5 = vld [vmem:[%s1389_s2 + $0x10] sm:$0xff] (!%p973_p5)  ;;  %v1206_v7 = vmov (!%p973_p5), 0.0|0.0   ;;  %vm1208_vm3 = vmmov (!%p973_p5), 0  }
  0x17   : > { %266 = sbr.rel (%p973_p5) target bundleno = 518 (0x206), region = 44  ;;  %v279_v2 = vld [vmem:[%s1389_s2] sm:$0xff] (!%p973_p5)  ;;  %398 = vxpose.xlu0.b32.start [1/6] (short) (narrow) (!%p973_p5), %v267_v1, 8  ;;  %v282_v6 = vld [vmem:[%s1389_s2 + $0x18] sm:$0xff] (!%p973_p5)  ;;  %1116 = vmatprep.subr.bf16.mxu1 (!%p973_p5), %v1206_v7  ;;  %v268_v8 = vld [vmem:[%s1388_s1 + $0x8] sm:$0xff] (!%p973_p5)  ;;  %v1209_v13 = vmov (!%p973_p5), 0.0  }
  0x18   : > { %v1108_v4 = vpack.c.bf16 (!%p973_p5), %v280_v3, %v279_v2  ;;  %v1112_v9 = vpack.c.bf16 (!%p973_p5), %v282_v6, %v281_v5  ;;  %v273_v10 = vld [vmem:[%s1387_s0] sm:$0xff] (!%p973_p5)  ;;  %v1207_v11 = vmov (!%p973_p5), 1.0|1.0   ;;  %v269_v12 = vld [vmem:[%s1388_s1 + $0x10] sm:$0xff] (!%p973_p5)  ;;  %1068 = vmatprep.mubr.msk.f32.mxu1 (!%p973_p5), %vm1208_vm3, %v1209_v13  ;;  %v274_v14 = vld [vmem:[%s1387_s0 + $0x8] sm:$0xff] (!%p973_p5)  ;;  %vm430_vm4 = vcmask (!%p973_p5), 392192  }
  0x19   : > { %1117 = vmatpush3.bf16.msra.mxu1 (!%p973_p5), %v1207_v11  ;;  %1047 = vmatprep.mubr.msk.f32.mxu0 (!%p973_p5), %vm283_vm2, %v273_v10  ;;  %v275_v15 = vld [vmem:[%s1387_s0 + $0x10] sm:$0xff] (!%p973_p5)  ;;  %v270_v16 = vld [vmem:[%s1388_s1 + $0x18] sm:$0xff] (!%p973_p5)  ;;  %v277_v18 = vld [vmem:[%s1387_s0 + $0x20] sm:$0xff] (!%p973_p5)  ;;  %v1210_v23 = vmov (!%p973_p5), 0   ;;  %vm505_vm5 = vcmask (!%p973_p5), 7168  }
  0x1a   : > { %1109 = vmatprep.subr.bf16.mxu0 (!%p973_p5), %v1108_v4  ;;  %1118 = vmatprep.subr.bf16.mxu1 (!%p973_p5), %v1206_v7  ;;  %v276_v17 = vld [vmem:[%s1387_s0 + $0x18] sm:$0xff] (!%p973_p5)  ;;  %v271_v19 = vld [vmem:[%s1388_s1 + $0x20] sm:$0xff] (!%p973_p5)  ;;  %v278_v20 = vld [vmem:[%s1387_s0 + $0x28] sm:$0xff] (!%p973_p5) }
  0x1b   : > { %1111 = vmatpush3.bf16.msra.mxu0 (!%p973_p5), %v1108_v4  ;;  %399 = vxpose.xlu0.b32.cont [2/6] (short) (narrow) (!%p973_p5), %v268_v8, 8  ;;  %v272_v21 = vld [vmem:[%s1388_s1 + $0x28] sm:$0xff] (!%p973_p5)  ;;  %v507_v40 = vld [vmem:[#allocation2] sm:$0xff] (!%p973_p5) }
  0x1c   : > { %1113 = vmatprep.subr.bf16.mxu0 (!%p973_p5), %v1112_v9  ;;  %1163 = vset.pattern.permute.xlu1 (!%p973_p5), %v1210_v23  ;;  %v397_v33 = vld [vmem:[#allocation3] sm:$0xff] (!%p973_p5) }
  0x1d   : > { %1119 = vmatpush3.bf16.msra.mxu1 (!%p973_p5), %v1207_v11 }
  0x1e   : > { %1120 = vmatprep.subr.bf16.mxu1 %v1206_v7 }
  0x1f   : > { %1115 = vmatpush3.bf16.msra.mxu0 %v1112_v9  ;;  %400 = vxpose.xlu0.b32.cont [3/6] (short) (narrow) %v269_v12, 8 }
  0x20   : > { %1122 = vmatprep.subr.bf16.mxu0 %v1206_v7 }
  0x21   : > { %1121 = vmatpush3.bf16.msra.mxu1 %v1207_v11 }
  0x22   : > { %1048 = vmatmul.mubr.msk.f32.vlgmr.msra.gmra.mrb[0].mxu0 %vm283_vm2, %v274_v14 }
  0x23   : > { %1050 = vmatprep.mubr.msk.f32.mxu0 %vm283_vm2, %v275_v15  ;;  %401 = vxpose.xlu0.b32.cont [4/6] (short) (narrow) %v270_v16, 8 }
  0x26   : > { %1051 = vmatmul.mubr.msk.f32.gmra.mrb[2].mxu0 %vm283_vm2, %v276_v17 }
  0x27   : > { %1053 = vmatprep.mubr.msk.f32.mxu0 %vm283_vm2, %v277_v18  ;;  %402 = vxpose.xlu0.b32.cont [5/6] (short) (narrow) %v271_v19, 8 }
  0x2a   : > { %1054 = vmatmul.mubr.msk.f32.gmra.mrb[4].mxu0 %vm283_vm2, %v278_v20 }
  0x2b   : > { %1083 = vmatprep.mubr.msk.f32.mxu0 %vm1208_vm3, %v1209_v13  ;;  %403 = vxpose.xlu0.b32.end [6/6] (short) (narrow) %v272_v21, 8 }
  0x54   : > { %1164 = vset.pattern.permute.xlu0 %v1210_v23 }
  0x97   : > { %v414_v22 = vpop.trf.xlu0 }
  0x98   : > { %1069 = vmatmul.mubr.msk.f32.vlgmr.msra.gmra.mrb[0].mxu1 %vm430_vm4, %v414_v22 }
  0xf5   : > { %v1049_v24 = vpop.f32.mrb[0].mxu0 }
  0xf6   : > { %v368_v25 = vpop.f32.mrb[1].mxu0 }
  0xf7   : > { %v1123_v26 = vpack.c.bf16 %v1049_v24, %v368_v25 }
  0xf9   : > { %v1052_v27 = vpop.f32.mrb[2].mxu0  ;;  %1124 = vmatpush3.bf16.msra.mxu0 %v1123_v26 }
  0xfa   : > { %v378_v28 = vpop.f32.mrb[3].mxu0  ;;  %1125 = vmatprep.subr.bf16.mxu0 %v1206_v7 }
  0xfb   : > { %v1126_v29 = vpack.c.bf16 %v1052_v27, %v378_v28 }
  0xfd   : > { %v1055_v30 = vpop.f32.mrb[4].mxu0  ;;  %1127 = vmatpush3.bf16.msra.mxu0 %v1126_v29 }
  0xfe   : > { %v388_v31 = vpop.f32.mrb[5].mxu0  ;;  %1128 = vmatprep.subr.bf16.mxu0 %v1206_v7 }
  0xff   : > { %v1129_v32 = vpack.c.bf16 %v1055_v30, %v388_v31 }
 0x101   : > { %1130 = vmatpush3.bf16.msra.mxu0 %v1129_v32 }
 0x104   : > { %1084 = vmatmul.mubr.msk.f32.vlgmr.msra.gmra.mrb[6].mxu0 %vm430_vm4, %v414_v22 }
 0x16b   : > { %v500_v34 = vpop.f32.mrb[0].mxu1 }
 0x16c   : > { %v504_v35 = vadd.f32 %v500_v34, %v397_v33  ;;  %v1070_v36 = vpop.f32.mrb[1].mxu1 }
 0x16e   : > { %506 = vst.msk [vmem:[#allocation3] sm:$0xff] %vm505_vm5, %v504_v35 }
 0x175   : > { %v583_v37 = vld [vmem:[#allocation3] sm:$0xff] }
 0x176   : > { %v584_v38 = vmax.f32 %v583_v37, 1e-12 }
 0x178   : > { %1165 = vrcp.f32 %v584_v38 }
 0x182   : > { %v1166_v39 = vpop.eup %1165 }
 0x183   : > { %589 = vperm.xlu1 %1163, %v1166_v39  }
 0x1d7   : > { %v574_v41 = vpop.f32.mrb[6].mxu0 }
 0x1d8   : > { %v578_v42 = vadd.f32 %v574_v41, %v507_v40  ;;  %v1085_v43 = vpop.f32.mrb[7].mxu0 }
 0x1da   : > { %579 = vst.msk [vmem:[#allocation2] sm:$0xff] %vm283_vm2, %v578_v42 }
 0x1e1   : > { %v586_v44 = vld [vmem:[#allocation2] sm:$0xff] }
 0x202   : > { %v590_v45 = vpop.permute.xlu1 %589 }
 0x203   : > { %v592_v46 = vmul.f32 %v590_v45, %v586_v44 }
 0x205   : > { %593 = vst.msk [vmem:[#allocation4] sm:$0xff] %vm283_vm2, %v592_v46 }
 0x206 PF: > { %p982_p6 = scmp.ne.s32.totalorder %s1195_s15, 1 }
 0x207   : > { %v598_v47 = vld [vmem:[%s1388_s1] sm:$0xff] (!%p982_p6)  ;;  %vm604_vm6 = vcmask (!%p982_p6), 64512   ;;  %v599_v48 = vld [vmem:[%s1388_s1 + $0x8] sm:$0xff] (!%p982_p6)  ;;  %v1211_v49 = vmov (!%p982_p6), 1.0   ;;  %v600_v50 = vld [vmem:[%s1388_s1 + $0x10] sm:$0xff] (!%p982_p6)  ;;  %v1212_v55 = vmov (!%p982_p6), 0  }
 0x208   : > { %597 = sbr.rel (%p982_p6) target bundleno = 892 (0x37c), region = 52  ;;  %1086 = vmatprep.subr.mxu0 (!%p982_p6), %v1211_v49  ;;  %1088 = vmatprep.mubr.msk.f32.mxu0 (!%p982_p6), %vm604_vm6, %v598_v47  ;;  %v601_v52 = vld [vmem:[%s1388_s1 + $0x18] sm:$0xff] (!%p982_p6)  ;;  %v602_v53 = vld [vmem:[%s1388_s1 + $0x20] sm:$0xff] (!%p982_p6)  ;;  %v603_v54 = vld [vmem:[%s1388_s1 + $0x28] sm:$0xff] (!%p982_p6)  ;;  %vm875_vm7 = vcmask (!%p982_p6), 261120  }
 0x209   : > { %1087 = vmatpush3.msra.mxu0 (!%p982_p6), %v1211_v49  ;;  %1099 = vmatprep.mubr.msk.f32.mxu1 (!%p982_p6), %vm604_vm6, %v598_v47  ;;  %v995_v16 = vld [vmem:[%s1390_s3] ss:$0 sm:$0xff] (!%p982_p6) }
 0x20a   : > { %1089 = vmatmul.mubr.msk.f32.vlgmr.msra.gmra.mrb[0].mxu0 (!%p982_p6), %vm604_vm6, %v599_v48  ;;  %1167 = vset.pattern.permute.xlu0 (!%p982_p6), %v1212_v55 }
 0x20b   : > { %1091 = vmatprep.mubr.msk.f32.mxu0 (!%p982_p6), %vm604_vm6, %v600_v50  ;;  %1168 = vset.pattern.permute.xlu1 (!%p982_p6), %v1212_v55 }
 0x20c   : > { %v730_v51 = vld [vmem:[#allocation4] sm:$0xff] (!%p982_p6) }
 0x20d   : > { %1097 = vmatprep.subr.mxu1 (!%p982_p6), %v730_v51 }
 0x20e   : > { %1098 = vmatpush3.msra.mxu1 (!%p982_p6), %v730_v51  ;;  %1092 = vmatmul.mubr.msk.f32.gmra.mrb[2].mxu0 (!%p982_p6), %vm604_vm6, %v601_v52 }
 0x20f   : > { %1100 = vmatmul.mubr.msk.f32.vlgmr.msra.gmra.mrb[0].mxu1 %vm604_vm6, %v599_v48  ;;  %1094 = vmatprep.mubr.msk.f32.mxu0 %vm604_vm6, %v602_v53 }
 0x210   : > { %1102 = vmatprep.mubr.msk.f32.mxu1 %vm604_vm6, %v600_v50 }
 0x212   : > { %1095 = vmatmul.mubr.msk.f32.gmra.mrb[4].mxu0 %vm604_vm6, %v603_v54 }
 0x213   : > { %1103 = vmatmul.mubr.msk.f32.gmra.mrb[2].mxu1 %vm604_vm6, %v601_v52 }
 0x214   : > { %1105 = vmatprep.mubr.msk.f32.mxu1 %vm604_vm6, %v602_v53 }
 0x217   : > { %1106 = vmatmul.mubr.msk.f32.gmra.mrb[4].mxu1 %vm604_vm6, %v603_v54 }
 0x2dd   : > { %v1090_v56 = vpop.f32.mrb[0].mxu0 }
 0x2de   : > { %v719_v57 = vmax.f32 %v1090_v56, 1e-12  ;;  %v689_v58 = vpop.f32.mrb[1].mxu0 }
 0x2df   : > { %v718_v59 = vmax.f32 %v689_v58, 1e-12 }
 0x2e0   : > { %1169 = vrcp.f32 %v719_v57 }
 0x2e1   : > { %v1093_v61 = vpop.f32.mrb[2].mxu0  ;;  %1171 = vrcp.f32 %v718_v59 }
 0x2e2   : > { %v1101_v60 = vpop.f32.mrb[0].mxu1  ;;  %v721_v62 = vmax.f32 %v1093_v61, 1e-12  ;;  %v699_v63 = vpop.f32.mrb[3].mxu0 }
 0x2e3   : > { %v720_v0 = vmax.f32 %v699_v63, 1e-12  ;;  %v797_v7 = vpop.f32.mrb[1].mxu1 }
 0x2e4   : > { %1173 = vrcp.f32 %v721_v62 }
 0x2e5   : > { %v1096_v1 = vpop.f32.mrb[4].mxu0  ;;  %1175 = vrcp.f32 %v720_v0 }
 0x2e6   : > { %v723_v2 = vmax.f32 %v1096_v1, 1e-12  ;;  %v709_v3 = vpop.f32.mrb[5].mxu0  ;;  %v1104_v9 = vpop.f32.mrb[2].mxu1 }
 0x2e7   : > { %v722_v4 = vmax.f32 %v709_v3, 1e-12  ;;  %v807_v10 = vpop.f32.mrb[3].mxu1 }
 0x2e9   : > { %1177 = vrcp.f32 %v722_v4 }
 0x2ea   : > { %v1170_v5 = vpop.eup %1169  ;;  %1179 = vrcp.f32 %v723_v2  ;;  %v1107_v12 = vpop.f32.mrb[4].mxu1 }
 0x2eb   : > { %833 = vperm.xlu0 %1167, %v1170_v5   ;;  %v1172_v6 = vpop.eup %1171  ;;  %v817_v14 = vpop.f32.mrb[5].mxu1 }
 0x2ee   : > { %v1174_v8 = vpop.eup %1173 }
 0x2ef   : > { %828 = vperm.xlu0 %1167, %v1172_v6   ;;  %843 = vperm.xlu1 %1168, %v1174_v8   ;;  %v1176_v11 = vpop.eup %1175 }
 0x2f3   : > { %v1178_v13 = vpop.eup %1177  ;;  %838 = vperm.xlu1 %1168, %v1176_v11  }
 0x2f4   : > { %v1180_v15 = vpop.eup %1179  ;;  %848 = vperm.xlu0 %1167, %v1178_v13  }
 0x2f7   : > { %853 = vperm.xlu1 %1168, %v1180_v15  }
 0x36a   : > { %v834_v17 = vpop.permute.xlu0 %833 }
 0x36b   : > { %v857_v18 = vmul.f32 %v1101_v60, %v834_v17 }
 0x36d   : > { %v870_v19 = vadd.f32 %v995_v16, %v857_v18 }
 0x36e   : > { %v829_v20 = vpop.permute.xlu0 %828  ;;  %v844_v21 = vpop.permute.xlu1 %843 }
 0x36f   : > { %877 = vst.msk [vmem:[%s1391_s4 + $0x8] sm:$0xff] %vm875_vm7, %v870_v19  ;;  %v856_v22 = vmul.f32 %v829_v20, %v797_v7  ;;  %v859_v23 = vmul.f32 %v1104_v9, %v844_v21 }
 0x371   : > { %v869_v24 = vadd.f32 %v995_v16, %v856_v22  ;;  %v872_v25 = vadd.f32 %v995_v16, %v859_v23 }
 0x372   : > { %v839_v26 = vpop.permute.xlu1 %838 }
 0x373   : > { %876 = vst.msk [vmem:[%s1391_s4] sm:$0xff] %vm875_vm7, %v869_v24  ;;  %879 = vst.msk [vmem:[%s1391_s4 + $0x18] sm:$0xff] %vm875_vm7, %v872_v25  ;;  %v858_v27 = vmul.f32 %v839_v26, %v807_v10  ;;  %v849_v28 = vpop.permute.xlu0 %848 }
 0x374   : > { %v860_v29 = vmul.f32 %v849_v28, %v817_v14 }
 0x375   : > { %v871_v30 = vadd.f32 %v995_v16, %v858_v27 }
 0x376   : > { %v873_v31 = vadd.f32 %v995_v16, %v860_v29  ;;  %v854_v32 = vpop.permute.xlu1 %853 }
 0x377   : > { %878 = vst.msk [vmem:[%s1391_s4 + $0x10] sm:$0xff] %vm875_vm7, %v871_v30  ;;  %v861_v33 = vmul.f32 %v1107_v12, %v854_v32 }
 0x378   : > { %880 = vst.msk [vmem:[%s1391_s4 + $0x20] sm:$0xff] %vm875_vm7, %v873_v31 }
 0x379   : > { %v874_v34 = vadd.f32 %v995_v16, %v861_v33 }
 0x37b   : > { %881 = vst.msk [vmem:[%s1391_s4 + $0x28] sm:$0xff] %vm875_vm7, %v874_v34 }
 0x37c PF: > { %s14_s17 = sadd.s32 1, %s1203_s17   ;;  %s1392_s15 = smov %s1199_s16 }
 0x37d   : > { %p11_p7 = scmp.ge.s32.totalorder %s14_s17, 4   ;;  %s1393_s16 = smov %s1395_s18 }
 0x37f   :  { %13 = sbr.rel (!%p11_p7) target bundleno = 2 (0x2), region = 85 }

</bundles_post_ra>
